<compile_context>
chip_gen: v7x
topology: tpu7x:2x2x1
jax: 0.10.0
libtpu: 0.0.40
codegen_flags: <defaults>
</compile_context>

<pallas_src>
import functools
import math

import jax
import jax.numpy as jnp
from jax.experimental import pallas as pl
from jax.experimental.pallas import tpu as pltpu


def _full_dense_decision_kernel(nsteps, x_ref, w_ref, b_ref, path_ref, perm_ref,
                                sel_in_ref, sel_in_t_ref, sel_out_ref, out_ref):
    # In-kernel bf16 cast of x (VPU slot has plenty of slack; avoids a separate
    # XLA cast pass over x in HBM). Linear on the MXU with f32 accumulation.
    x = x_ref[...].astype(jnp.bfloat16)                                   # (TB, F)
    logits = jnp.dot(x, w_ref[...], preferred_element_type=jnp.float32)   # (TB, OI)
    logits = logits + b_ref[...]                                          # (1, OI) broadcast

    # Per-(batch, in_node) group max over the out_node axis.  Flat column
    # j = o*I + i, so each group {i, i+I, ..., i+(O-1)I} is invariant under a
    # cyclic shift by I.  A log2(O) shift-and-max tree computes the group max
    # broadcast to every column; the shifts are 0/1 permutation matmuls (MXU),
    # which avoids in-kernel reshapes / unaligned lane slicing entirely.
    gmax = logits
    for k in range(nsteps):
        gmax = jnp.maximum(
            gmax, jnp.dot(gmax, perm_ref[k], preferred_element_type=jnp.float32))

    # Stable per-group exponentials: at least one element per group hits 0 in the
    # exponent, so every group's denominator is >= 1 (no underflow-to-zero).
    e = jnp.exp(logits - gmax)                                            # (TB, OI)

    # denom[b, i] = sum_o e[b, o*I + i]   (0/1 selection matmul, lane-dense)
    denom = jnp.dot(e, sel_in_ref[...], preferred_element_type=jnp.float32)   # (TB, I)

    # Fold the softmax denominator into path once, then broadcast back to the
    # flat (TB, O*I) layout with the transposed selector.
    sp = path_ref[...] / denom                                            # (TB, I)
    sp_full = jnp.dot(sp, sel_in_t_ref[...],
                      preferred_element_type=jnp.float32)                 # (TB, OI)

    # out[b, o] = sum_i e[b, o*I + i] * path[b, i] / denom[b, i]
    out_ref[...] = jnp.dot(e * sp_full, sel_out_ref[...],
                           preferred_element_type=jnp.float32)            # (TB, O)


def prepare_full_dense_decision_params(weight, bias, in_nodes):
    """One-time (model-load-time) preprocessing of the static Linear parameters.

    Do NOT call this inside the per-step jitted path: the weight transpose+cast
    is a full F*(O*I) HBM pass that should happen exactly once for inference
    weights, and the selectors/permutations are pure constants.
    """
    weight = jnp.asarray(weight, dtype=jnp.float32)      # (O*I, F) PyTorch layout
    bias = jnp.asarray(bias, dtype=jnp.float32)          # (O*I,)
    OI, F = weight.shape
    I = int(in_nodes)
    assert OI % I == 0
    O = OI // I

    wT = weight.T.astype(jnp.bfloat16)                   # (F, OI) resident MXU input
    b2 = bias.reshape(1, OI)                             # (1, OI) f32

    j = jnp.arange(OI)
    # 0/1 selectors encoding the (o, i) grouping of flat column j = o*I + i.
    sel_in = (j[:, None] % I == jnp.arange(I)[None, :]).astype(jnp.float32)    # (OI, I)
    sel_out = (j[:, None] // I == jnp.arange(O)[None, :]).astype(jnp.float32)  # (OI, O)
    sel_in_t = jnp.transpose(sel_in)                                           # (I, OI)

    # Cyclic shift-by-(I * 2^k) permutation matrices for the group-max tree.
    nsteps = max(1, (O - 1).bit_length())
    perms = []
    for k in range(nsteps):
        s = (I * (1 << k)) % OI
        perms.append((((j[:, None] + s) % OI) == j[None, :]).astype(jnp.float32))
    perm = jnp.stack(perms, axis=0)                                            # (nsteps, OI, OI)

    return dict(wT=wT, bias=b2, sel_in=sel_in, sel_in_t=sel_in_t,
                sel_out=sel_out, perm=perm, num_features=F,
                in_nodes=I, out_nodes=O, nsteps=nsteps)


def full_dense_decision_forward(x, path, params, *, block_batch=512):
    """FullDenseDecision.forward (default single-Linear Transition + softmax).

    x:      (B, F)  activations (f32; quantized to bf16 in-kernel for the MXU)
    path:   (B, I)  path probabilities over in_nodes (f32)
    params: output of prepare_full_dense_decision_params (static, hoisted)
    returns (B, O) float32
    """
    B, F = x.shape
    I = params["in_nodes"]
    O = params["out_nodes"]
    nsteps = params["nsteps"]
    OI = O * I
    assert F == params["num_features"]
    assert path.shape == (B, I)

    xf = jnp.asarray(x, jnp.float32)
    p = jnp.asarray(path, jnp.float32)

    # --- batch tile selection -------------------------------------------------
    # * second-to-last block dim must be a multiple of 8 (or equal the full B)
    # * prefer >= 2 tiles so dimension_semantics=("parallel",) can feed both
    #   TensorCores on v7x
    # * keep double-buffered per-batch blocks + resident bf16 W^T + f32
    #   temporaries inside a conservative 48 MiB budget (v7x: 64 MiB / TC).
    def _est_vmem(tb):
        return (2 * tb * F * 4 + 2 * tb * I * 4 + 2 * tb * O * 4       # pipelined per-batch blocks
                + F * OI * 2                                            # resident bf16 W^T
                + (OI * I + I * OI + OI * O + nsteps * OI * OI + OI) * 4  # constants
                + 6 * tb * OI * 4)                                      # in-kernel f32 temporaries

    if B <= 8:
        TB = B
    else:
        TB = max(8, min(block_batch, ((B + 1) // 2 + 7) // 8 * 8))     # >= 2 tiles when possible
    budget = 48 << 20
    while TB > 8 and _est_vmem(TB) > budget:
        TB = max(8, (TB // 2 + 7) // 8 * 8)
    grid = (pl.cdiv(B, TB),)
    vmem_limit = int(min(max(2 * _est_vmem(TB), 32 << 20), 64 << 20))

    cost = pl.CostEstimate(
        flops=int(2 * B * OI * (F + nsteps * OI + 2 * I + O)),
        bytes_accessed=int(B * F * 4 + F * OI * 2 + B * (I + O) * 8
                           + (nsteps * OI * OI + 2 * OI * I + OI * O + OI) * 4),
        transcendentals=int(B * OI),
    )

    kernel = functools.partial(_full_dense_decision_kernel, nsteps)
    args = (xf, params["wT"], params["bias"], p, params["perm"],
            params["sel_in"], params["sel_in_t"], params["sel_out"])

    def build(single_buffer_consts):
        # Constant-block-index inputs never change across grid steps; request a
        # single VMEM buffer for them (saves F*OI*2 + selector bytes of VMEM).
        ckw = dict(pipeline_mode=pl.Buffered(1)) if single_buffer_consts else {}
        in_specs = [
            pl.BlockSpec((TB, F), lambda i: (i, 0)),                      # x     (batch-tiled)
            pl.BlockSpec((F, OI), lambda i: (0, 0), **ckw),               # W^T   (resident)
            pl.BlockSpec((1, OI), lambda i: (0, 0), **ckw),               # bias
            pl.BlockSpec((TB, I), lambda i: (i, 0)),                      # path  (batch-tiled)
            pl.BlockSpec((nsteps, OI, OI), lambda i: (0, 0, 0), **ckw),   # shift perms
            pl.BlockSpec((OI, I), lambda i: (0, 0), **ckw),               # sel_in
            pl.BlockSpec((I, OI), lambda i: (0, 0), **ckw),               # sel_in^T
            pl.BlockSpec((OI, O), lambda i: (0, 0), **ckw),               # sel_out
        ]
        return pl.pallas_call(
            kernel,
            out_shape=jax.ShapeDtypeStruct((B, O), jnp.float32),
            grid=grid,
            in_specs=in_specs,
            out_specs=pl.BlockSpec((TB, O), lambda i: (i, 0)),
            compiler_params=pltpu.CompilerParams(
                dimension_semantics=("parallel",),   # shard batch tiles across TCs (v7x)
                vmem_limit_bytes=vmem_limit,
            ),
            cost_estimate=cost,
        )

    try:
        return build(True)(*args)
    except Exception:
        # pipeline_mode=pl.Buffered(1) is a VMEM-saving hint only; fall back to
        # default double-buffered specs if this jax/libtpu doesn't accept it.
        return build(False)(*args)


def reference_forward(x, path, weight, bias):
    B = x.shape[0]
    I = path.shape[1]
    O = weight.shape[0] // I
    y = x @ weight.T + bias                               # (B, O*I)
    mat = y.reshape(B, O, I)
    mat_t = jax.nn.softmax(mat, axis=1)                   # softmax over out_nodes
    return jnp.einsum('boi,bi->bo', mat_t, path)          # (B, O)


if __name__ == "__main__":
    # Small deterministic config: num_features=32, in_nodes=8, out_nodes=8, batch=32.
    B, F, I, O = 32, 32, 8, 8

    key = jax.random.PRNGKey(0)
    kx, kp, kw, kb = jax.random.split(key, 4)

    x = jax.random.normal(kx, (B, F), dtype=jnp.float32)
    path = jax.random.uniform(kp, (B, I), dtype=jnp.float32)
    path = path / jnp.sum(path, axis=1, keepdims=True)    # path is a distribution

    # nn.Linear(num_features, out_nodes * in_nodes) init: U(-1/sqrt(F), 1/sqrt(F))
    bound = 1.0 / math.sqrt(F)
    weight = jax.random.uniform(kw, (O * I, F), minval=-bound, maxval=bound,
                                dtype=jnp.float32)
    bias = jax.random.uniform(kb, (O * I,), minval=-bound, maxval=bound,
                              dtype=jnp.float32)

    # Static-param preprocessing happens once, outside the per-call path.
    params = prepare_full_dense_decision_params(weight, bias, in_nodes=I)

    # Reference under the same bf16 input quantization the kernel applies
    # (intentional inference-time tolerance).
    x_q = x.astype(jnp.bfloat16).astype(jnp.float32)
    w_q = weight.astype(jnp.bfloat16).astype(jnp.float32)

    # 1) block_batch=8 -> 4 batch tiles (exercises the pipelined batch tiling).
    out = jax.block_until_ready(
        full_dense_decision_forward(x, path, params, block_batch=8))
    ref = reference_forward(x_q, path, w_q, bias)
    assert out.shape == (B, O)
    assert jnp.allclose(out, ref, atol=1e-4, rtol=1e-4), \
        float(jnp.max(jnp.abs(out - ref)))

    # 2) Group-underflow stress test: every column outside in_node group i=0 is
    #    pushed ~100 above it.  With a global row max this underflows group 0's
    #    softmax denominator to zero (inf/NaN); the per-group max fix must keep
    #    the result finite and correct.  Uses the default block_batch (2 tiles).
    bias_hard = bias + 100.0 * (jnp.arange(O * I) % I != 0).astype(jnp.float32)
    params_hard = prepare_full_dense_decision_params(weight, bias_hard, in_nodes=I)
    out_hard = jax.block_until_ready(
        full_dense_decision_forward(x, path, params_hard))
    ref_hard = reference_forward(x_q, path, w_q, bias_hard)
    assert bool(jnp.all(jnp.isfinite(out_hard)))
    assert jnp.allclose(out_hard, ref_hard, atol=1e-4, rtol=1e-4), \
        float(jnp.max(jnp.abs(out_hard - ref_hard)))

    # TODO(synk): only the default Transition (num_layers=1, single nn.Linear)
    # with the default softmax activation is implemented; num_layers=0 (Bias)
    # and multi-layer GroupedLinear/ELU/Dropout Transitions are not wired up.
    print("KERNEL_OK")
</pallas_src>

<mosaic_0001>
module attributes {stable_mosaic.version = 11 : i64} {
  func.func @_full_dense_decision_kernel(%arg0: i32, %arg1: memref<8x32xf32, #tpu.memory_space<vmem>>, %arg2: memref<32x64xbf16, #tpu.memory_space<vmem>>, %arg3: memref<1x64xf32, #tpu.memory_space<vmem>>, %arg4: memref<8x8xf32, #tpu.memory_space<vmem>>, %arg5: memref<3x64x64xf32, #tpu.memory_space<vmem>>, %arg6: memref<64x8xf32, #tpu.memory_space<vmem>>, %arg7: memref<8x64xf32, #tpu.memory_space<vmem>>, %arg8: memref<64x8xf32, #tpu.memory_space<vmem>>, %arg9: memref<8x8xf32, #tpu.memory_space<vmem>>) attributes {dimension_semantics = [#tpu.dimension_semantics<parallel>], iteration_bounds = array<i64: 4>, scalar_prefetch = 0 : i64, scratch_operands = 0 : i64, tpu.core_type = #tpu.core_type<tc>, window_params = [{transform_indices = @transform_0, window_bounds = array<i64: 8, 32>}, {pipeline_mode = #tpu.pipeline_mode<synchronous>, transform_indices = @transform_1, window_bounds = array<i64: 32, 64>}, {pipeline_mode = #tpu.pipeline_mode<synchronous>, transform_indices = @transform_2, window_bounds = array<i64: 1, 64>}, {transform_indices = @transform_3, window_bounds = array<i64: 8, 8>}, {pipeline_mode = #tpu.pipeline_mode<synchronous>, transform_indices = @transform_4, window_bounds = array<i64: 3, 64, 64>}, {pipeline_mode = #tpu.pipeline_mode<synchronous>, transform_indices = @transform_5, window_bounds = array<i64: 64, 8>}, {pipeline_mode = #tpu.pipeline_mode<synchronous>, transform_indices = @transform_6, window_bounds = array<i64: 8, 64>}, {pipeline_mode = #tpu.pipeline_mode<synchronous>, transform_indices = @transform_7, window_bounds = array<i64: 64, 8>}, {transform_indices = @transform_8, window_bounds = array<i64: 8, 8>}]} {
    %c0 = arith.constant 0 : index
    %c0_0 = arith.constant 0 : index
    %0 = vector.load %arg1[%c0, %c0_0] : memref<8x32xf32, #tpu.memory_space<vmem>>, vector<8x32xf32>
    %1 = arith.truncf %0 : vector<8x32xf32> to vector<8x32xbf16>
    %c0_1 = arith.constant 0 : index
    %c0_2 = arith.constant 0 : index
    %2 = vector.load %arg2[%c0_1, %c0_2] : memref<32x64xbf16, #tpu.memory_space<vmem>>, vector<32x64xbf16>
    %cst = arith.constant dense<0.000000e+00> : vector<8x64xf32>
    %3 = tpu.matmul %1, %2, %cst {dimension_numbers = #tpu.dot_dimension_numbers<[1], [0], [0], [1], [0, 0, 1, 1], [], []>} : vector<8x32xbf16>, vector<32x64xbf16>, vector<8x64xf32> -> vector<8x64xf32>
    %c0_3 = arith.constant 0 : index
    %c0_4 = arith.constant 0 : index
    %4 = vector.load %arg3[%c0_3, %c0_4] : memref<1x64xf32, #tpu.memory_space<vmem>>, vector<1x64xf32>
    %5 = vector.broadcast %4 : vector<1x64xf32> to vector<8x64xf32>
    %6 = arith.addf %3, %5 : vector<8x64xf32>
    %c0_5 = arith.constant 0 : index
    %c0_6 = arith.constant 0 : index
    %c0_7 = arith.constant 0 : index
    %7 = vector.load %arg5[%c0_5, %c0_6, %c0_7] : memref<3x64x64xf32, #tpu.memory_space<vmem>>, vector<1x64x64xf32>
    %8 = vector.shape_cast %7 : vector<1x64x64xf32> to vector<64x64xf32>
    %cst_8 = arith.constant dense<0.000000e+00> : vector<8x64xf32>
    %9 = tpu.matmul %6, %8, %cst_8 {dimension_numbers = #tpu.dot_dimension_numbers<[1], [0], [0], [1], [0, 0, 1, 1], [], []>} : vector<8x64xf32>, vector<64x64xf32>, vector<8x64xf32> -> vector<8x64xf32>
    %10 = arith.maximumf %6, %9 : vector<8x64xf32>
    %c1 = arith.constant 1 : index
    %c0_9 = arith.constant 0 : index
    %c0_10 = arith.constant 0 : index
    %11 = vector.load %arg5[%c1, %c0_9, %c0_10] : memref<3x64x64xf32, #tpu.memory_space<vmem>>, vector<1x64x64xf32>
    %12 = vector.shape_cast %11 : vector<1x64x64xf32> to vector<64x64xf32>
    %cst_11 = arith.constant dense<0.000000e+00> : vector<8x64xf32>
    %13 = tpu.matmul %10, %12, %cst_11 {dimension_numbers = #tpu.dot_dimension_numbers<[1], [0], [0], [1], [0, 0, 1, 1], [], []>} : vector<8x64xf32>, vector<64x64xf32>, vector<8x64xf32> -> vector<8x64xf32>
    %14 = arith.maximumf %10, %13 : vector<8x64xf32>
    %c2 = arith.constant 2 : index
    %c0_12 = arith.constant 0 : index
    %c0_13 = arith.constant 0 : index
    %15 = vector.load %arg5[%c2, %c0_12, %c0_13] : memref<3x64x64xf32, #tpu.memory_space<vmem>>, vector<1x64x64xf32>
    %16 = vector.shape_cast %15 : vector<1x64x64xf32> to vector<64x64xf32>
    %cst_14 = arith.constant dense<0.000000e+00> : vector<8x64xf32>
    %17 = tpu.matmul %14, %16, %cst_14 {dimension_numbers = #tpu.dot_dimension_numbers<[1], [0], [0], [1], [0, 0, 1, 1], [], []>} : vector<8x64xf32>, vector<64x64xf32>, vector<8x64xf32> -> vector<8x64xf32>
    %18 = arith.maximumf %14, %17 : vector<8x64xf32>
    %19 = arith.subf %6, %18 : vector<8x64xf32>
    %20 = math.exp %19 : vector<8x64xf32>
    %c0_15 = arith.constant 0 : index
    %c0_16 = arith.constant 0 : index
    %21 = vector.load %arg6[%c0_15, %c0_16] : memref<64x8xf32, #tpu.memory_space<vmem>>, vector<64x8xf32>
    %cst_17 = arith.constant dense<0.000000e+00> : vector<8x8xf32>
    %22 = tpu.matmul %20, %21, %cst_17 {dimension_numbers = #tpu.dot_dimension_numbers<[1], [0], [0], [1], [0, 0, 1, 1], [], []>} : vector<8x64xf32>, vector<64x8xf32>, vector<8x8xf32> -> vector<8x8xf32>
    %c0_18 = arith.constant 0 : index
    %c0_19 = arith.constant 0 : index
    %23 = vector.load %arg4[%c0_18, %c0_19] : memref<8x8xf32, #tpu.memory_space<vmem>>, vector<8x8xf32>
    %24 = arith.divf %23, %22 : vector<8x8xf32>
    %c0_20 = arith.constant 0 : index
    %c0_21 = arith.constant 0 : index
    %25 = vector.load %arg7[%c0_20, %c0_21] : memref<8x64xf32, #tpu.memory_space<vmem>>, vector<8x64xf32>
    %cst_22 = arith.constant dense<0.000000e+00> : vector<8x64xf32>
    %26 = tpu.matmul %24, %25, %cst_22 {dimension_numbers = #tpu.dot_dimension_numbers<[1], [0], [0], [1], [0, 0, 1, 1], [], []>} : vector<8x8xf32>, vector<8x64xf32>, vector<8x64xf32> -> vector<8x64xf32>
    %27 = arith.mulf %20, %26 : vector<8x64xf32>
    %c0_23 = arith.constant 0 : index
    %c0_24 = arith.constant 0 : index
    %28 = vector.load %arg8[%c0_23, %c0_24] : memref<64x8xf32, #tpu.memory_space<vmem>>, vector<64x8xf32>
    %cst_25 = arith.constant dense<0.000000e+00> : vector<8x8xf32>
    %29 = tpu.matmul %27, %28, %cst_25 {dimension_numbers = #tpu.dot_dimension_numbers<[1], [0], [0], [1], [0, 0, 1, 1], [], []>} : vector<8x64xf32>, vector<64x8xf32>, vector<8x8xf32> -> vector<8x8xf32>
    %c0_26 = arith.constant 0 : index
    %c0_27 = arith.constant 0 : index
    %30 = vector.load %arg9[%c0_26, %c0_27] : memref<8x8xf32, #tpu.memory_space<vmem>>, vector<8x8xf32>
    tpu.vector_store %arg9[%c0_26, %c0_27], %29 {strides = array<i32>} : memref<8x8xf32, #tpu.memory_space<vmem>>, vector<8x8xf32>,
    return
  }
  func.func @transform_0(%arg0: i32) -> (i32, i32) {
    %c0_i32 = arith.constant 0 : i32
    %c0_i32_0 = arith.constant 0 : i32
    return %arg0, %c0_i32 : i32, i32
  }
  func.func @transform_1(%arg0: i32) -> (i32, i32) {
    %c0_i32 = arith.constant 0 : i32
    %c0_i32_0 = arith.constant 0 : i32
    %c0_i32_1 = arith.constant 0 : i32
    return %c0_i32, %c0_i32_0 : i32, i32
  }
  func.func @transform_2(%arg0: i32) -> (i32, i32) {
    %c0_i32 = arith.constant 0 : i32
    %c0_i32_0 = arith.constant 0 : i32
    %c0_i32_1 = arith.constant 0 : i32
    return %c0_i32, %c0_i32_0 : i32, i32
  }
  func.func @transform_3(%arg0: i32) -> (i32, i32) {
    %c0_i32 = arith.constant 0 : i32
    %c0_i32_0 = arith.constant 0 : i32
    return %arg0, %c0_i32 : i32, i32
  }
  func.func @transform_4(%arg0: i32) -> (i32, i32, i32) {
    %c0_i32 = arith.constant 0 : i32
    %c0_i32_0 = arith.constant 0 : i32
    %c0_i32_1 = arith.constant 0 : i32
    %c0_i32_2 = arith.constant 0 : i32
    return %c0_i32, %c0_i32_0, %c0_i32_1 : i32, i32, i32
  }
  func.func @transform_5(%arg0: i32) -> (i32, i32) {
    %c0_i32 = arith.constant 0 : i32
    %c0_i32_0 = arith.constant 0 : i32
    %c0_i32_1 = arith.constant 0 : i32
    return %c0_i32, %c0_i32_0 : i32, i32
  }
  func.func @transform_6(%arg0: i32) -> (i32, i32) {
    %c0_i32 = arith.constant 0 : i32
    %c0_i32_0 = arith.constant 0 : i32
    %c0_i32_1 = arith.constant 0 : i32
    return %c0_i32, %c0_i32_0 : i32, i32
  }
  func.func @transform_7(%arg0: i32) -> (i32, i32) {
    %c0_i32 = arith.constant 0 : i32
    %c0_i32_0 = arith.constant 0 : i32
    %c0_i32_1 = arith.constant 0 : i32
    return %c0_i32, %c0_i32_0 : i32, i32
  }
  func.func @transform_8(%arg0: i32) -> (i32, i32) {
    %c0_i32 = arith.constant 0 : i32
    %c0_i32_0 = arith.constant 0 : i32
    return %arg0, %c0_i32 : i32, i32
  }
}

module attributes {stable_mosaic.version = 11 : i64} {
  func.func @_full_dense_decision_kernel(%arg0: i32, %arg1: memref<8x32xf32, #tpu.memory_space<vmem>>, %arg2: memref<32x64xbf16, #tpu.memory_space<vmem>>, %arg3: memref<1x64xf32, #tpu.memory_space<vmem>>, %arg4: memref<8x8xf32, #tpu.memory_space<vmem>>, %arg5: memref<3x64x64xf32, #tpu.memory_space<vmem>>, %arg6: memref<64x8xf32, #tpu.memory_space<vmem>>, %arg7: memref<8x64xf32, #tpu.memory_space<vmem>>, %arg8: memref<64x8xf32, #tpu.memory_space<vmem>>, %arg9: memref<8x8xf32, #tpu.memory_space<vmem>>) attributes {dimension_semantics = [#tpu.dimension_semantics<parallel>], iteration_bounds = array<i64: 4>, scalar_prefetch = 0 : i64, scratch_operands = 0 : i64, tpu.core_type = #tpu.core_type<tc>, window_params = [{transform_indices = @transform_0, window_bounds = array<i64: 8, 32>}, {pipeline_mode = #tpu.pipeline_mode<synchronous>, transform_indices = @transform_1, window_bounds = array<i64: 32, 64>}, {pipeline_mode = #tpu.pipeline_mode<synchronous>, transform_indices = @transform_2, window_bounds = array<i64: 1, 64>}, {transform_indices = @transform_3, window_bounds = array<i64: 8, 8>}, {pipeline_mode = #tpu.pipeline_mode<synchronous>, transform_indices = @transform_4, window_bounds = array<i64: 3, 64, 64>}, {pipeline_mode = #tpu.pipeline_mode<synchronous>, transform_indices = @transform_5, window_bounds = array<i64: 64, 8>}, {pipeline_mode = #tpu.pipeline_mode<synchronous>, transform_indices = @transform_6, window_bounds = array<i64: 8, 64>}, {pipeline_mode = #tpu.pipeline_mode<synchronous>, transform_indices = @transform_7, window_bounds = array<i64: 64, 8>}, {transform_indices = @transform_8, window_bounds = array<i64: 8, 8>}]} {
    %c0 = arith.constant 0 : index
    %c0_0 = arith.constant 0 : index
    %0 = vector.load %arg1[%c0, %c0_0] : memref<8x32xf32, #tpu.memory_space<vmem>>, vector<8x32xf32>
    %1 = arith.truncf %0 : vector<8x32xf32> to vector<8x32xbf16>
    %c0_1 = arith.constant 0 : index
    %c0_2 = arith.constant 0 : index
    %2 = vector.load %arg2[%c0_1, %c0_2] : memref<32x64xbf16, #tpu.memory_space<vmem>>, vector<32x64xbf16>
    %cst = arith.constant dense<0.000000e+00> : vector<8x64xf32>
    %3 = tpu.matmul %1, %2, %cst {dimension_numbers = #tpu.dot_dimension_numbers<[1], [0], [0], [1], [0, 0, 1, 1], [], []>} : vector<8x32xbf16>, vector<32x64xbf16>, vector<8x64xf32> -> vector<8x64xf32>
    %c0_3 = arith.constant 0 : index
    %c0_4 = arith.constant 0 : index
    %4 = vector.load %arg3[%c0_3, %c0_4] : memref<1x64xf32, #tpu.memory_space<vmem>>, vector<1x64xf32>
    %5 = vector.broadcast %4 : vector<1x64xf32> to vector<8x64xf32>
    %6 = arith.addf %3, %5 : vector<8x64xf32>
    %c0_5 = arith.constant 0 : index
    %c0_6 = arith.constant 0 : index
    %c0_7 = arith.constant 0 : index
    %7 = vector.load %arg5[%c0_5, %c0_6, %c0_7] : memref<3x64x64xf32, #tpu.memory_space<vmem>>, vector<1x64x64xf32>
    %8 = vector.shape_cast %7 : vector<1x64x64xf32> to vector<64x64xf32>
    %cst_8 = arith.constant dense<0.000000e+00> : vector<8x64xf32>
    %9 = tpu.matmul %6, %8, %cst_8 {dimension_numbers = #tpu.dot_dimension_numbers<[1], [0], [0], [1], [0, 0, 1, 1], [], []>} : vector<8x64xf32>, vector<64x64xf32>, vector<8x64xf32> -> vector<8x64xf32>
    %10 = arith.maximumf %6, %9 : vector<8x64xf32>
    %c1 = arith.constant 1 : index
    %c0_9 = arith.constant 0 : index
    %c0_10 = arith.constant 0 : index
    %11 = vector.load %arg5[%c1, %c0_9, %c0_10] : memref<3x64x64xf32, #tpu.memory_space<vmem>>, vector<1x64x64xf32>
    %12 = vector.shape_cast %11 : vector<1x64x64xf32> to vector<64x64xf32>
    %cst_11 = arith.constant dense<0.000000e+00> : vector<8x64xf32>
    %13 = tpu.matmul %10, %12, %cst_11 {dimension_numbers = #tpu.dot_dimension_numbers<[1], [0], [0], [1], [0, 0, 1, 1], [], []>} : vector<8x64xf32>, vector<64x64xf32>, vector<8x64xf32> -> vector<8x64xf32>
    %14 = arith.maximumf %10, %13 : vector<8x64xf32>
    %c2 = arith.constant 2 : index
    %c0_12 = arith.constant 0 : index
    %c0_13 = arith.constant 0 : index
    %15 = vector.load %arg5[%c2, %c0_12, %c0_13] : memref<3x64x64xf32, #tpu.memory_space<vmem>>, vector<1x64x64xf32>
    %16 = vector.shape_cast %15 : vector<1x64x64xf32> to vector<64x64xf32>
    %cst_14 = arith.constant dense<0.000000e+00> : vector<8x64xf32>
    %17 = tpu.matmul %14, %16, %cst_14 {dimension_numbers = #tpu.dot_dimension_numbers<[1], [0], [0], [1], [0, 0, 1, 1], [], []>} : vector<8x64xf32>, vector<64x64xf32>, vector<8x64xf32> -> vector<8x64xf32>
    %18 = arith.maximumf %14, %17 : vector<8x64xf32>
    %19 = arith.subf %6, %18 : vector<8x64xf32>
    %20 = math.exp %19 : vector<8x64xf32>
    %c0_15 = arith.constant 0 : index
    %c0_16 = arith.constant 0 : index
    %21 = vector.load %arg6[%c0_15, %c0_16] : memref<64x8xf32, #tpu.memory_space<vmem>>, vector<64x8xf32>
    %cst_17 = arith.constant dense<0.000000e+00> : vector<8x8xf32>
    %22 = tpu.matmul %20, %21, %cst_17 {dimension_numbers = #tpu.dot_dimension_numbers<[1], [0], [0], [1], [0, 0, 1, 1], [], []>} : vector<8x64xf32>, vector<64x8xf32>, vector<8x8xf32> -> vector<8x8xf32>
    %c0_18 = arith.constant 0 : index
    %c0_19 = arith.constant 0 : index
    %23 = vector.load %arg4[%c0_18, %c0_19] : memref<8x8xf32, #tpu.memory_space<vmem>>, vector<8x8xf32>
    %24 = arith.divf %23, %22 : vector<8x8xf32>
    %c0_20 = arith.constant 0 : index
    %c0_21 = arith.constant 0 : index
    %25 = vector.load %arg7[%c0_20, %c0_21] : memref<8x64xf32, #tpu.memory_space<vmem>>, vector<8x64xf32>
    %cst_22 = arith.constant dense<0.000000e+00> : vector<8x64xf32>
    %26 = tpu.matmul %24, %25, %cst_22 {dimension_numbers = #tpu.dot_dimension_numbers<[1], [0], [0], [1], [0, 0, 1, 1], [], []>} : vector<8x8xf32>, vector<8x64xf32>, vector<8x64xf32> -> vector<8x64xf32>
    %27 = arith.mulf %20, %26 : vector<8x64xf32>
    %c0_23 = arith.constant 0 : index
    %c0_24 = arith.constant 0 : index
    %28 = vector.load %arg8[%c0_23, %c0_24] : memref<64x8xf32, #tpu.memory_space<vmem>>, vector<64x8xf32>
    %cst_25 = arith.constant dense<0.000000e+00> : vector<8x8xf32>
    %29 = tpu.matmul %27, %28, %cst_25 {dimension_numbers = #tpu.dot_dimension_numbers<[1], [0], [0], [1], [0, 0, 1, 1], [], []>} : vector<8x64xf32>, vector<64x8xf32>, vector<8x8xf32> -> vector<8x8xf32>
    %c0_26 = arith.constant 0 : index
    %c0_27 = arith.constant 0 : index
    %30 = vector.load %arg9[%c0_26, %c0_27] : memref<8x8xf32, #tpu.memory_space<vmem>>, vector<8x8xf32>
    tpu.vector_store %arg9[%c0_26, %c0_27], %29 {strides = array<i32>} : memref<8x8xf32, #tpu.memory_space<vmem>>, vector<8x8xf32>,
    return
  }
  func.func @transform_0(%arg0: i32) -> (i32, i32) {
    %c0_i32 = arith.constant 0 : i32
    %c0_i32_0 = arith.constant 0 : i32
    return %arg0, %c0_i32 : i32, i32
  }
  func.func @transform_1(%arg0: i32) -> (i32, i32) {
    %c0_i32 = arith.constant 0 : i32
    %c0_i32_0 = arith.constant 0 : i32
    %c0_i32_1 = arith.constant 0 : i32
    return %c0_i32, %c0_i32_0 : i32, i32
  }
  func.func @transform_2(%arg0: i32) -> (i32, i32) {
    %c0_i32 = arith.constant 0 : i32
    %c0_i32_0 = arith.constant 0 : i32
    %c0_i32_1 = arith.constant 0 : i32
    return %c0_i32, %c0_i32_0 : i32, i32
  }
  func.func @transform_3(%arg0: i32) -> (i32, i32) {
    %c0_i32 = arith.constant 0 : i32
    %c0_i32_0 = arith.constant 0 : i32
    return %arg0, %c0_i32 : i32, i32
  }
  func.func @transform_4(%arg0: i32) -> (i32, i32, i32) {
    %c0_i32 = arith.constant 0 : i32
    %c0_i32_0 = arith.constant 0 : i32
    %c0_i32_1 = arith.constant 0 : i32
    %c0_i32_2 = arith.constant 0 : i32
    return %c0_i32, %c0_i32_0, %c0_i32_1 : i32, i32, i32
  }
  func.func @transform_5(%arg0: i32) -> (i32, i32) {
    %c0_i32 = arith.constant 0 : i32
    %c0_i32_0 = arith.constant 0 : i32
    %c0_i32_1 = arith.constant 0 : i32
    return %c0_i32, %c0_i32_0 : i32, i32
  }
  func.func @transform_6(%arg0: i32) -> (i32, i32) {
    %c0_i32 = arith.constant 0 : i32
    %c0_i32_0 = arith.constant 0 : i32
    %c0_i32_1 = arith.constant 0 : i32
    return %c0_i32, %c0_i32_0 : i32, i32
  }
  func.func @transform_7(%arg0: i32) -> (i32, i32) {
    %c0_i32 = arith.constant 0 : i32
    %c0_i32_0 = arith.constant 0 : i32
    %c0_i32_1 = arith.constant 0 : i32
    return %c0_i32, %c0_i32_0 : i32, i32
  }
  func.func @transform_8(%arg0: i32) -> (i32, i32) {
    %c0_i32 = arith.constant 0 : i32
    %c0_i32_0 = arith.constant 0 : i32
    return %arg0, %c0_i32 : i32, i32
  }
}

</mosaic_0001>

<bundles_post_ra>
// kernel: tpu_custom_call.1
= control target key start
LH: loop header
LB: loop body
LE: loop exit
PB: predicated region body
PF: predicated region fallthrough
CT: control target
= control target key end

     0   :  { %13 = vsyncpa [#allocation3], 0  ;;  %s1787_s0 = inlined_call_operand.hbm [shape: f32[32,32], index: 0, kind: input, shape index: {}]   ;;  %s1788_s1 = inlined_call_operand.hbm [shape: bf16[32,64], index: 1, kind: input, shape index: {}]   ;;  %s1789_s2 = inlined_call_operand.vmem [shape: f32[1,64], index: 2, kind: input, shape index: {}]   ;;  %s1790_s3 = inlined_call_operand.vmem [shape: f32[32,8], index: 3, kind: input, shape index: {}]   ;;  %s1791_s4 = inlined_call_operand.vmem [shape: f32[3,64,64], index: 4, kind: input, shape index: {}]   ;;  %s1792_s5 = inlined_call_operand.vmem [shape: f32[64,8], index: 5, kind: input, shape index: {}]   ;;  %s1793_s6 = inlined_call_operand.vmem [shape: f32[8,64], index: 6, kind: input, shape index: {}]   ;;  %s1794_s7 = inlined_call_operand.vmem [shape: f32[64,8], index: 7, kind: input, shape index: {}]   ;;  %s1795_s8 = inlined_call_operand.vmem [shape: f32[32,8], index: 8, kind: output, shape index: {}]  }
   0x1   :  { %15 = vsyncpa [#allocation3 + $0x1], 0 }
   0x2   :  { %16 = vsyncpa [#allocation5], 0  ;;  %s1472_s27 = smov 0   ;;  %s1474_s28 = smov 0  }
   0x3   :  { %s1476_s29 = smov 0   ;;  %s1478_s30 = smov 0  }
   0x4 LB: > { %s1491_s9 = sadd.s32 4294967295, %s1418_s30   ;;  %p42_p0 = scmp.ne.s32.totalorder %s1410_s28, %s1406_s27  ;;  %s1418_s30 = sphi %s1478_s30, %s1810_s30   ;;  %s1414_s29 = sphi %s1476_s29, %s1809_s29   ;;  %s1410_s28 = sphi %s1474_s28, %s1808_s28   ;;  %s1406_s27 = sphi %s1472_s27, %s1807_s27  }
   0x5   : > { %p1796_p1 = scmp.eq.s32.totalorder %s1491_s9, 0  ;;  %p1005_p2 = scmp.ge.s32.totalorder %s1418_s30, 1 }
   0x6   : > { %p231_p3 = scmp.lt.s32.totalorder %s1418_s30, 5  ;;  %s1420_s12 = smov [#allocation4]  }
   0x7   : > { %p1499_p4 = por %p1796_p1, %p42_p0  ;;  %s243_s13 = sshll.u32 %s1420_s12, 4  ;;  %s244_s13 = int_to_ptr.vmem [resolvable:$true] %s243_s13 }
   0x8   : > { %p1503_p5 = pnand %p1005_p2, %p231_p3  ;;  %s1516_s15 = sadd.s32 1, %s1418_s30  }
   0x9   : > { %s1799_s10 = scalar_select %p1499_p4, 1, 0 }
   0xa   : > { %s1800_s11 = scalar_select %p1503_p5, 1, 0 }
   0xb   : > { %p1267_p6 = pneg %p1503_p5  ;;  %s29_s16 = sadd.s32 1, %s1414_s29 }
   0xc   : > { %s26_s17 = ssub.s32 %s1418_s30, %s1516_s15  ;;  %s1322_s20 = scalar_lea.hbm %s1788_s1, 256 }
   0xd   : > { %p1511_p7 = pnand %p1267_p6, %p1796_p1  ;;  %p1323_p8 = scmp.ne.s32.totalorder %s1788_s1, %s1322_s20 }
   0xe   : > { %p1329_p12 = scmp.lt.u32.totalorder %s1322_s20, %s1788_s1 }
   0xf   : > { %p1324_p9 = pneg %p1511_p7 }
  0x11   : > { %p1325_p10 = pnand %p1324_p9, %p1323_p8 }
  0x13   : > { %p1326_p11 = pneg %p1325_p10 }
  0x15   : > { %p1331_p13 = pnand %p1329_p12, %p1326_p11 }
  0x17   : > { %1334 = shalt.err (!%p1331_p13)
}
  0x18   : > { %s1335_s25 = scalar_lea.vmem %s244_s13, 256  ;;  %p1343_p6 = scmp.lt.s32.totalorder %s244_s13, %s244_s13 }
  0x19   : > { %p1336_p0 = scmp.ne.s32.totalorder %s244_s13, %s1335_s25  ;;  %p1344_p1 = scmp.lt.s32.totalorder %s1335_s25, %s1335_s25 }
  0x1b   : > { %p1338_p2 = pnand %p1336_p0, %p1324_p9  ;;  %p1345_p4 = por %p1344_p1, %p1343_p6 }
  0x1d   : > { %p1339_p3 = pneg %p1338_p2 }
  0x1f   : > { %p1346_p5 = pnand %p1345_p4, %p1339_p3 }
  0x21   : > { %1349 = shalt.err (!%p1346_p5)
}
  0x22   : > { %s1421_s26 = smov 64   ;;  %s1422_s27 = smov 4  }
  0x23   : > { %1270 = dma.hbm_to_vmem [thread:$0]  (!%p1511_p7), %s1788_s1, 256, %s244_s13, [#allocation5], %s1421_s26, %s1421_s26, %s1422_s27  }
  0x24   : > { %p27_p8 = scmp.eq.s32.totalorder %s26_s17, 0  ;;  %p36_p9 = scmp.ne.s32.totalorder %s1414_s29, %s1410_s28 }
  0x25   : > { %p37_p1 = scmp.eq.s32.totalorder %s1418_s30, 0  ;;  %p1276_p4 = scmp.lt.s32.totalorder %s1418_s30, 4 }
  0x26   : > { %s1542_s19 = scalar_select %p27_p8, %s1414_s29, %s29_s16  }
  0x27   : > { %p38_p5 = por %p37_p1, %p36_p9  ;;  %s272_s20 = sand.u32 1, %s1414_s29  }
  0x28   : > { %s1008_s21 = sshll.u32 %s272_s20, 3  ;;  %s1009_s22 = sshll.u32 %s1418_s30, 7 }
  0x29   : > { %s1549_s25 = scalar_lea.hbm %s1787_s0, %s1009_s22  ;;  %s276_s13 = scalar_lea.vmem [#allocation2], %s1008_s21 }
  0x2a   : > { %s283_s14 = sshll.u32 %s276_s13, 4  ;;  %p1553_p7 = pnand %p1276_p4, %p38_p5  ;;  %s1551_s14 = int_to_ptr.vmem [resolvable:$true] %s283_s14 }
  0x2b   : > { %s273_s30 = scalar_lea.sflag [#allocation3], %s272_s20  ;;  %s1350_s17 = scalar_lea.hbm %s1549_s25, 128 }
  0x2c   : > { %p1351_p10 = scmp.ne.s32.totalorder %s1549_s25, %s1350_s17  ;;  %p1352_p11 = pneg %p1553_p7 }
  0x2d   : > { %s1355_s12 = scalar_lea.hbm %s1787_s0, 512  ;;  %p1356_p0 = scmp.lt.u32.totalorder %s1549_s25, %s1787_s0 }
  0x2e   : > { %p1353_p12 = pnand %p1352_p11, %p1351_p10  ;;  %p1357_p2 = scmp.lt.u32.totalorder %s1355_s12, %s1350_s17 }
  0x2f   : > { %p1359_p6 = scmp.lt.u32.totalorder %s1350_s17, %s1549_s25 }
  0x30   : > { %p1354_p13 = pneg %p1353_p12  ;;  %p1358_p3 = por %p1357_p2, %p1356_p0 }
  0x32   : > { %p1360_p8 = por %p1359_p6, %p1358_p3 }
  0x34   : > { %p1361_p9 = pnand %p1360_p8, %p1354_p13 }
  0x36   : > { %1364 = shalt.err (!%p1361_p9)
}
  0x37   : > { %s1365_s20 = scalar_lea.vmem %s1551_s14, 128  ;;  %s1423_s22 = smov [#allocation2]  }
  0x38   : > { %p1366_p1 = scmp.ne.s32.totalorder %s1551_s14, %s1365_s20  ;;  %s1370_s23 = sshll.u32 %s1423_s22, 4  ;;  %s1371_s23 = int_to_ptr.vmem [resolvable:$false] %s1370_s23 }
  0x39   : > { %s1372_s24 = scalar_lea.vmem %s1371_s23, 256  ;;  %p1373_p10 = scmp.lt.s32.totalorder %s1551_s14, %s1371_s23 }
  0x3a   : > { %p1368_p4 = pnand %p1366_p1, %p1352_p11  ;;  %p1374_p12 = scmp.lt.s32.totalorder %s1372_s24, %s1365_s20 }
  0x3c   : > { %p1369_p5 = pneg %p1368_p4  ;;  %p1375_p0 = por %p1374_p12, %p1373_p10 }
  0x3e   : > { %p1376_p2 = pnand %p1375_p0, %p1369_p5 }
  0x40   : > { %1379 = shalt.err (!%p1376_p2)
}
  0x41   : > { %1274 = dma.hbm_to_vmem [thread:$0]  (!%p1553_p7), %s1549_s25, 128, %s1551_s14, %s273_s30  }
  0x42   : > { %p1803_p13 = scmp.ne.s32.totalorder %s1800_s11, 0 }
  0x43   : > { %s301_s13 = sand.u32 (!%p1803_p13), 1, %s1410_s28   ;;  %p1804_p11 = scmp.ne.s32.totalorder (!%p1803_p13), %s1799_s10, 0 }
  0x44   : > { %299 = sbr.rel (%p1803_p13) target bundleno = 1612 (0x64c), region = 52  ;;  %s1011_s17 = sshll.u32 (!%p1803_p13), %s301_s13, 3 }
  0x45   : > { %s302_s26 = scalar_lea.sflag (!%p1803_p13), [#allocation3], %s301_s13  ;;  %s305_s27 = scalar_lea.vmem (!%p1803_p13), [#allocation2], %s1011_s17 }
  0x4b   : > { %1397 = dma.done.wait (%p1804_p11), %s302_s26, 128  }
  0x4c   : > { %1399 = vsyncadd (%p1804_p11), %s302_s26, 4294967168  ;;  %p1805_p3 = scmp.eq.s32.totalorder %s1491_s9, 0 }
  0x4e   : > { %1401 = dma.done.wait (%p1805_p3), [#allocation5], 256   ;;  %p1806_p6 = pmov %p1805_p3 }
  0x4f   : > { %v1424_v0 = vmov 0.0   ;;  %vm1425_vm0 = vmmov 0   ;;  %v1426_v1 = vmov 0.0|0.0   ;;  %v1316_v2 = vld [vmem:[#allocation4] sm:$0xff]   ;;  %v1317_v3 = vld [vmem:[#allocation4 + $0x8] sm:$0xff]   ;;  %v354_v4 = vld [vmem:[%s305_s27] sm:$0xff] }
  0x50   : > { %1403 = vsyncadd (%p1806_p6), [#allocation5], 4294967040  ;;  %1093 = vmatprep.subr.bf16.mxu0 %v1424_v0  ;;  %1097 = vmatprep.mubr.msk.bf16.mxu0 %vm1425_vm0, %v1424_v0  ;;  %v423_v5 = vld [vmem:[%s1791_s4] sm:$0xff]  ;;  %v424_v6 = vld [vmem:[%s1791_s4 + $0x8] sm:$0xff]  ;;  %v355_v10 = vpack.c.bf16 %v354_v4, %v354_v4  ;;  %vm379_vm1 = vcmask 261120   ;;  %vm431_vm2 = vcmask 523264  }
  0x51   : > { %1201 = vmatprep.subr.bf16.mxu1 %v1426_v1  ;;  %1117 = vmatprep.mubr.msk.f32.mxu1 %vm1425_vm0, %v1424_v0  ;;  %v1202_v7 = vpack.c.bf16 %v424_v6, %v423_v5  ;;  %v425_v8 = vld [vmem:[%s1791_s4 + $0x10] sm:$0xff]  ;;  %v426_v9 = vld [vmem:[%s1791_s4 + $0x18] sm:$0xff]  ;;  %v427_v12 = vld [vmem:[%s1791_s4 + $0x20] sm:$0xff]  ;;  %p345_p7 = scmp.lt.s32.totalorder %s1491_s9, 3  ;;  %vm760_vm3 = vcmask 64512  }
  0x52   : > { %1094 = vmatpush3.bf16.msra.mxu0 %v1316_v2  ;;  %v1205_v11 = vpack.c.bf16 %v426_v9, %v425_v8  ;;  %v428_v13 = vld [vmem:[%s1791_s4 + $0x28] sm:$0xff]  ;;  %v429_v15 = vld [vmem:[%s1791_s4 + $0x30] sm:$0xff]  ;;  %v430_v16 = vld [vmem:[%s1791_s4 + $0x38] sm:$0xff] }
  0x53   : > { %1095 = vmatprep.subr.bf16.mxu0 %v1424_v0  ;;  %1203 = vmatpush3.bf16.msra.mxu1 %v1202_v7  ;;  %v1208_v14 = vpack.c.bf16 %v428_v13, %v427_v12  ;;  %v1211_v17 = vpack.c.bf16 %v430_v16, %v429_v15  ;;  %v1020_v18 = vld [vmem:[%s1791_s4 + $0x40] sm:$0xff]  ;;  %v1021_v19 = vld [vmem:[%s1791_s4 + $0x48] sm:$0xff]  ;;  %v1022_v20 = vld [vmem:[%s1791_s4 + $0x50] sm:$0xff]  ;;  %s1812_s9 = smov (!%p345_p7, %s1491_s9), 3 }
  0x54   : > { %1204 = vmatprep.subr.bf16.mxu1 %v1426_v1  ;;  %v1214_v21 = vpack.c.bf16 %v1021_v19, %v1020_v18  ;;  %v1023_v22 = vld [vmem:[%s1791_s4 + $0x58] sm:$0xff]  ;;  %v1024_v24 = vld [vmem:[%s1791_s4 + $0x60] sm:$0xff]  ;;  %v1025_v25 = vld [vmem:[%s1791_s4 + $0x68] sm:$0xff]  ;;  %s1013_s24 = sshll.u32 %s1812_s9, 3 }
  0x55   : > { %v1217_v23 = vpack.c.bf16 %v1023_v22, %v1022_v20  ;;  %v1220_v26 = vpack.c.bf16 %v1025_v25, %v1024_v24  ;;  %v1015_v27 = vld [vmem:[%s1789_s2] ss:$0 sm:$0xff]  ;;  %v1026_v33 = vld [vmem:[%s1791_s4 + $0x70] sm:$0xff]  ;;  %v1027_v34 = vld [vmem:[%s1791_s4 + $0x78] sm:$0xff]  ;;  %s348_s26 = scalar_lea.vmem %s1790_s3, %s1013_s24  ;;  %s352_s16 = scalar_lea.vmem %s1795_s8, %s1013_s24 }
  0x56   : > { %1096 = vmatpush3.bf16.msra.mxu0 %v1317_v3  ;;  %v1223_v35 = vpack.c.bf16 %v1027_v34, %v1026_v33  ;;  %v1029_v36 = vld [vmem:[%s1791_s4 + $0x80] sm:$0xff]  ;;  %v1030_v37 = vld [vmem:[%s1791_s4 + $0x88] sm:$0xff]  ;;  %v1031_v38 = vld [vmem:[%s1791_s4 + $0x90] sm:$0xff] }
  0x57   : > { %1213 = vmatprep.subr.bf16.mxu0 %v1426_v1  ;;  %1206 = vmatpush3.bf16.msra.mxu1 %v1205_v11  ;;  %v1226_v39 = vpack.c.bf16 %v1030_v37, %v1029_v36  ;;  %v1032_v40 = vld [vmem:[%s1791_s4 + $0x98] sm:$0xff]  ;;  %v1033_v42 = vld [vmem:[%s1791_s4 + $0xa0] sm:$0xff]  ;;  %v1034_v43 = vld [vmem:[%s1791_s4 + $0xa8] sm:$0xff] }
  0x58   : > { %1207 = vmatprep.subr.bf16.mxu1 %v1426_v1  ;;  %v1229_v41 = vpack.c.bf16 %v1032_v40, %v1031_v38  ;;  %v1232_v44 = vpack.c.bf16 %v1034_v43, %v1033_v42  ;;  %v1035_v48 = vld [vmem:[%s1791_s4 + $0xb0] sm:$0xff]  ;;  %v1036_v49 = vld [vmem:[%s1791_s4 + $0xb8] sm:$0xff]  ;;  %v675_v54 = vld [vmem:[%s1792_s5] sm:$0xff] }
  0x59   : > { %1098 = vmatmul.mubr.msk.bf16.vlgmr.msra.gmra.mrb[0].mxu0 %vm379_vm1, %v355_v10  ;;  %v1235_v50 = vpack.c.bf16 %v1036_v49, %v1035_v48  ;;  %v676_v55 = vld [vmem:[%s1792_s5 + $0x8] sm:$0xff]  ;;  %v677_v57 = vld [vmem:[%s1792_s5 + $0x10] sm:$0xff]  ;;  %v678_v58 = vld [vmem:[%s1792_s5 + $0x18] sm:$0xff] }
  0x5a   : > { %1136 = vmatprep.mubr.msk.f32.mxu0 %vm1425_vm0, %v1424_v0  ;;  %1215 = vmatpush3.bf16.msra.mxu0 %v1214_v21  ;;  %v1238_v56 = vpack.c.bf16 %v676_v55, %v675_v54  ;;  %v1241_v59 = vpack.c.bf16 %v678_v58, %v677_v57  ;;  %v679_v60 = vld [vmem:[%s1792_s5 + $0x20] sm:$0xff]  ;;  %v680_v61 = vld [vmem:[%s1792_s5 + $0x28] sm:$0xff]  ;;  %v681_v63 = vld [vmem:[%s1792_s5 + $0x30] sm:$0xff] }
  0x5b   : > { %1209 = vmatpush3.bf16.msra.mxu1 %v1208_v14  ;;  %1216 = vmatprep.subr.bf16.mxu0 %v1426_v1  ;;  %v1244_v62 = vpack.c.bf16 %v680_v61, %v679_v60  ;;  %v682_v2 = vld [vmem:[%s1792_s5 + $0x38] sm:$0xff]  ;;  %v759_v10 = vld [vmem:[%s1793_s6] sm:$0xff]  ;;  %v836_v12 = vld [vmem:[%s1794_s7 + $0x8] sm:$0xff] }
  0x5c   : > { %1210 = vmatprep.subr.bf16.mxu1 %v1426_v1  ;;  %v1247_v3 = vpack.c.bf16 %v682_v2, %v681_v63  ;;  %v835_v11 = vld [vmem:[%s1794_s7] sm:$0xff]  ;;  %v837_v13 = vld [vmem:[%s1794_s7 + $0x10] sm:$0xff]  ;;  %v838_v14 = vld [vmem:[%s1794_s7 + $0x18] sm:$0xff] }
  0x5d   : > { %v1253_v15 = vpack.c.bf16 %v838_v14, %v837_v13  ;;  %v839_v16 = vld [vmem:[%s1794_s7 + $0x20] sm:$0xff]  ;;  %v841_v24 = vld [vmem:[%s1794_s7 + $0x30] sm:$0xff] }
  0x5e   : > { %1218 = vmatpush3.bf16.msra.mxu0 %v1217_v23  ;;  %v756_v21 = vld [vmem:[%s348_s26] sm:$0xff] }
  0x5f   : > { %1212 = vmatpush3.bf16.msra.mxu1 %v1211_v17  ;;  %1219 = vmatprep.subr.bf16.mxu0 %v1426_v1  ;;  %v840_v17 = vld [vmem:[%s1794_s7 + $0x28] sm:$0xff] }
  0x60   : > { %1225 = vmatprep.subr.bf16.mxu1 %v1426_v1  ;;  %v1256_v18 = vpack.c.bf16 %v840_v17, %v839_v16 }
  0x62   : > { %1221 = vmatpush3.bf16.msra.mxu0 %v1220_v26 }
  0x63   : > { %1222 = vmatprep.subr.bf16.mxu0 %v1426_v1 }
  0x66   : > { %1224 = vmatpush3.bf16.msra.mxu0 %v1223_v35 }
  0x67   : > { %1237 = vmatprep.subr.bf16.mxu0 %v1426_v1 }
 0x12c   : > { %v417_v28 = vpop.f32.mrb[0].mxu0 }
 0x12d   : > { %v1655_v29 = vadd.f32 %v1015_v27, %v417_v28  ;;  %v1099_v30 = vpop.f32.mrb[1].mxu0 }
 0x12e   : > { %v420_v31 = vpop.f32.mrb[2].mxu0 }
 0x12f   : > { %v1100_v32 = vpop.f32.mrb[3].mxu0  ;;  %1118 = vmatmul.mubr.msk.f32.vlgmr.msra.gmra.mrb[0].mxu1 %vm431_vm2, %v1655_v29 }
 0x130   : > { %1155 = vmatprep.mubr.msk.f32.mxu1 %vm1425_vm0, %v1424_v0  ;;  %1227 = vmatpush3.bf16.msra.mxu1 %v1226_v39 }
 0x131   : > { %1228 = vmatprep.subr.bf16.mxu1 %v1426_v1 }
 0x134   : > { %1230 = vmatpush3.bf16.msra.mxu1 %v1229_v41 }
 0x135   : > { %1231 = vmatprep.subr.bf16.mxu1 %v1426_v1 }
 0x138   : > { %1233 = vmatpush3.bf16.msra.mxu1 %v1232_v44 }
 0x139   : > { %1234 = vmatprep.subr.bf16.mxu1 %v1426_v1 }
 0x13c   : > { %1236 = vmatpush3.bf16.msra.mxu1 %v1235_v50 }
 0x13d   : > { %1249 = vmatprep.subr.bf16.mxu1 %v1426_v1 }
 0x202   : > { %v501_v45 = vpop.f32.mrb[0].mxu1 }
 0x203   : > { %v505_v46 = vmax.f32 %v1655_v29, %v501_v45  ;;  %v1119_v47 = vpop.f32.mrb[1].mxu1 }
 0x205   : > { %1137 = vmatmul.mubr.msk.f32.vlgmr.msra.gmra.mrb[4].mxu0 %vm431_vm2, %v505_v46 }
 0x206   : > { %1174 = vmatprep.mubr.msk.f32.mxu0 %vm1425_vm0, %v1424_v0  ;;  %1239 = vmatpush3.bf16.msra.mxu0 %v1238_v56 }
 0x207   : > { %1240 = vmatprep.subr.bf16.mxu0 %v1426_v1 }
 0x20a   : > { %1242 = vmatpush3.bf16.msra.mxu0 %v1241_v59 }
 0x20b   : > { %1243 = vmatprep.subr.bf16.mxu0 %v1426_v1 }
 0x20e   : > { %1245 = vmatpush3.bf16.msra.mxu0 %v1244_v62 }
 0x20f   : > { %1246 = vmatprep.subr.bf16.mxu0 %v1426_v1 }
 0x212   : > { %1248 = vmatpush3.bf16.msra.mxu0 %v1247_v3 }
 0x213   : > { %1177 = vmatprep.subr.mxu0 %v1424_v0 }
 0x2d8   : > { %v584_v51 = vpop.f32.mrb[4].mxu0 }
 0x2d9   : > { %v588_v52 = vmax.f32 %v505_v46, %v584_v51  ;;  %v1138_v53 = vpop.f32.mrb[5].mxu0 }
 0x2db   : > { %1156 = vmatmul.mubr.msk.f32.vlgmr.msra.gmra.mrb[2].mxu1 %vm431_vm2, %v588_v52 }
 0x2dc   : > { %1198 = vmatprep.mubr.msk.f32.mxu1 %vm1425_vm0, %v1424_v0 }
 0x3ae   : > { %v667_v4 = vpop.f32.mrb[2].mxu1 }
 0x3af   : > { %v671_v5 = vmax.f32 %v588_v52, %v667_v4  ;;  %v1157_v6 = vpop.f32.mrb[3].mxu1 }
 0x3b1   : > { %v672_v7 = vsub.f32 %v1655_v29, %v671_v5 }
 0x3b3   : > { %v673_v8 = vmul.f32 1.442695, %v672_v7 }
 0x3b5   : > { %1318 = vpow2.f32 %v673_v8 }
 0x3bf   : > { %v1319_v9 = vpop.eup %1318 }
 0x3c0   : > { %1175 = vmatmul.mubr.msk.f32.vlgmr.msra.gmra.mrb[6].mxu0 %vm431_vm2, %v1319_v9 }
 0x3c1   : > { %1179 = vmatprep.mubr.msk.f32.mxu0 %vm1425_vm0, %v1424_v0  ;;  %1178 = vmatpush3.msra.mxu0 %v759_v10  ;;  %v1250_v0 = vpack.c.bf16 %v836_v12, %v835_v11 }
 0x3c3   : > { %1251 = vmatpush3.bf16.msra.mxu1 %v1250_v0 }
 0x3c4   : > { %1252 = vmatprep.subr.bf16.mxu1 %v1426_v1 }
 0x3c7   : > { %1254 = vmatpush3.bf16.msra.mxu1 %v1253_v15 }
 0x3c8   : > { %1255 = vmatprep.subr.bf16.mxu1 %v1426_v1 }
 0x3cb   : > { %1257 = vmatpush3.bf16.msra.mxu1 %v1256_v18 }
 0x3cc   : > { %1258 = vmatprep.subr.bf16.mxu1 %v1426_v1  ;;  %v842_v1 = vld [vmem:[%s1794_s7 + $0x38] sm:$0xff] }
 0x3cd   : > { %v1259_v25 = vpack.c.bf16 %v842_v1, %v841_v24 }
 0x3cf   : > { %1260 = vmatpush3.bf16.msra.mxu1 %v1259_v25 }
 0x493   : > { %v752_v19 = vpop.f32.mrb[6].mxu0 }
 0x494   : > { %1320 = vrcp.f32 %v752_v19  ;;  %v1176_v20 = vpop.f32.mrb[7].mxu0 }
 0x49e   : > { %v1321_v22 = vpop.eup %1320 }
 0x49f   : > { %v758_v23 = vmul.f32 %v1321_v22, %v756_v21 }
 0x4a1   : > { %1180 = vmatmul.mubr.msk.f32.vlgmr.msra.gmra.mrb[8].mxu0 %vm760_vm3, %v758_v23 }
 0x574   : > { %v830_v26 = vpop.f32.mrb[8].mxu0 }
 0x575   : > { %v834_v27 = vmul.f32 %v1319_v9, %v830_v26  ;;  %v1181_v28 = vpop.f32.mrb[9].mxu0 }
 0x577   : > { %1199 = vmatmul.mubr.msk.f32.vlgmr.msra.gmra.mrb[4].mxu1 %vm431_vm2, %v834_v27 }
 0x64a   : > { %v912_v29 = vpop.f32.mrb[4].mxu1 }
 0x64b   : > { %916 = vst.msk [vmem:[%s352_s16] sm:$0xff] %vm760_vm3, %v912_v29  ;;  %v1200_v30 = vpop.f32.mrb[5].mxu1 }
 0x64c PF: > { %p19_p8 = scmp.ge.s32.totalorder %s1516_s15, 6   ;;  %s1807_s27 = smov %s1410_s28 }
 0x64d   : > { %s1808_s28 = smov %s1414_s29  ;;  %s1809_s29 = smov %s1542_s19 }
 0x64e   : > { %s1810_s30 = smov %s1516_s15  ;;  %21 = sbr.rel (!%p19_p8) target bundleno = 4 (0x4), region = 101 }
 0x655   :  { %936 = vsyncpa [#allocation3], 1 }
 0x656   :  { %938 = vsyncpa [#allocation3 + $0x1], 1 }
 0x657   :  { %939 = vsyncpa [#allocation5], 1 }

// kernel: tpu_custom_call.1
= control target key start
LH: loop header
LB: loop body
LE: loop exit
PB: predicated region body
PF: predicated region fallthrough
CT: control target
= control target key end

     0   :  { %13 = vsyncpa [#allocation3], 0  ;;  %s1787_s0 = inlined_call_operand.hbm [shape: f32[32,32], index: 0, kind: input, shape index: {}]   ;;  %s1788_s1 = inlined_call_operand.hbm [shape: bf16[32,64], index: 1, kind: input, shape index: {}]   ;;  %s1789_s2 = inlined_call_operand.vmem [shape: f32[1,64], index: 2, kind: input, shape index: {}]   ;;  %s1790_s3 = inlined_call_operand.vmem [shape: f32[32,8], index: 3, kind: input, shape index: {}]   ;;  %s1791_s4 = inlined_call_operand.vmem [shape: f32[3,64,64], index: 4, kind: input, shape index: {}]   ;;  %s1792_s5 = inlined_call_operand.vmem [shape: f32[64,8], index: 5, kind: input, shape index: {}]   ;;  %s1793_s6 = inlined_call_operand.vmem [shape: f32[8,64], index: 6, kind: input, shape index: {}]   ;;  %s1794_s7 = inlined_call_operand.vmem [shape: f32[64,8], index: 7, kind: input, shape index: {}]   ;;  %s1795_s8 = inlined_call_operand.vmem [shape: f32[32,8], index: 8, kind: output, shape index: {}]  }
   0x1   :  { %15 = vsyncpa [#allocation3 + $0x1], 0 }
   0x2   :  { %16 = vsyncpa [#allocation5], 0  ;;  %s1472_s27 = smov 0   ;;  %s1474_s28 = smov 0  }
   0x3   :  { %s1476_s29 = smov 0   ;;  %s1478_s30 = smov 0  }
   0x4 LB: > { %s1491_s9 = sadd.s32 4294967295, %s1418_s30   ;;  %p42_p0 = scmp.ne.s32.totalorder %s1410_s28, %s1406_s27  ;;  %s1418_s30 = sphi %s1478_s30, %s1810_s30   ;;  %s1414_s29 = sphi %s1476_s29, %s1809_s29   ;;  %s1410_s28 = sphi %s1474_s28, %s1808_s28   ;;  %s1406_s27 = sphi %s1472_s27, %s1807_s27  }
   0x5   : > { %p1796_p1 = scmp.eq.s32.totalorder %s1491_s9, 0  ;;  %p1005_p2 = scmp.ge.s32.totalorder %s1418_s30, 1 }
   0x6   : > { %p231_p3 = scmp.lt.s32.totalorder %s1418_s30, 5  ;;  %s1420_s12 = smov [#allocation4]  }
   0x7   : > { %p1499_p4 = por %p1796_p1, %p42_p0  ;;  %s243_s13 = sshll.u32 %s1420_s12, 4  ;;  %s244_s13 = int_to_ptr.vmem [resolvable:$true] %s243_s13 }
   0x8   : > { %p1503_p5 = pnand %p1005_p2, %p231_p3  ;;  %s1516_s15 = sadd.s32 1, %s1418_s30  }
   0x9   : > { %s1799_s10 = scalar_select %p1499_p4, 1, 0 }
   0xa   : > { %s1800_s11 = scalar_select %p1503_p5, 1, 0 }
   0xb   : > { %p1267_p6 = pneg %p1503_p5  ;;  %s29_s16 = sadd.s32 1, %s1414_s29 }
   0xc   : > { %s26_s17 = ssub.s32 %s1418_s30, %s1516_s15  ;;  %s1322_s20 = scalar_lea.hbm %s1788_s1, 256 }
   0xd   : > { %p1511_p7 = pnand %p1267_p6, %p1796_p1  ;;  %p1323_p8 = scmp.ne.s32.totalorder %s1788_s1, %s1322_s20 }
   0xe   : > { %p1329_p12 = scmp.lt.u32.totalorder %s1322_s20, %s1788_s1 }
   0xf   : > { %p1324_p9 = pneg %p1511_p7 }
  0x11   : > { %p1325_p10 = pnand %p1324_p9, %p1323_p8 }
  0x13   : > { %p1326_p11 = pneg %p1325_p10 }
  0x15   : > { %p1331_p13 = pnand %p1329_p12, %p1326_p11 }
  0x17   : > { %1334 = shalt.err (!%p1331_p13)
}
  0x18   : > { %s1335_s25 = scalar_lea.vmem %s244_s13, 256  ;;  %p1343_p6 = scmp.lt.s32.totalorder %s244_s13, %s244_s13 }
  0x19   : > { %p1336_p0 = scmp.ne.s32.totalorder %s244_s13, %s1335_s25  ;;  %p1344_p1 = scmp.lt.s32.totalorder %s1335_s25, %s1335_s25 }
  0x1b   : > { %p1338_p2 = pnand %p1336_p0, %p1324_p9  ;;  %p1345_p4 = por %p1344_p1, %p1343_p6 }
  0x1d   : > { %p1339_p3 = pneg %p1338_p2 }
  0x1f   : > { %p1346_p5 = pnand %p1345_p4, %p1339_p3 }
  0x21   : > { %1349 = shalt.err (!%p1346_p5)
}
  0x22   : > { %s1421_s26 = smov 64   ;;  %s1422_s27 = smov 4  }
  0x23   : > { %1270 = dma.hbm_to_vmem [thread:$0]  (!%p1511_p7), %s1788_s1, 256, %s244_s13, [#allocation5], %s1421_s26, %s1421_s26, %s1422_s27  }
  0x24   : > { %p27_p8 = scmp.eq.s32.totalorder %s26_s17, 0  ;;  %p36_p9 = scmp.ne.s32.totalorder %s1414_s29, %s1410_s28 }
  0x25   : > { %p37_p1 = scmp.eq.s32.totalorder %s1418_s30, 0  ;;  %p1276_p4 = scmp.lt.s32.totalorder %s1418_s30, 4 }
  0x26   : > { %s1542_s19 = scalar_select %p27_p8, %s1414_s29, %s29_s16  }
  0x27   : > { %p38_p5 = por %p37_p1, %p36_p9  ;;  %s272_s20 = sand.u32 1, %s1414_s29  }
  0x28   : > { %s1008_s21 = sshll.u32 %s272_s20, 3  ;;  %s1009_s22 = sshll.u32 %s1418_s30, 7 }
  0x29   : > { %s1549_s25 = scalar_lea.hbm %s1787_s0, %s1009_s22  ;;  %s276_s13 = scalar_lea.vmem [#allocation2], %s1008_s21 }
  0x2a   : > { %s283_s14 = sshll.u32 %s276_s13, 4  ;;  %p1553_p7 = pnand %p1276_p4, %p38_p5  ;;  %s1551_s14 = int_to_ptr.vmem [resolvable:$true] %s283_s14 }
  0x2b   : > { %s273_s30 = scalar_lea.sflag [#allocation3], %s272_s20  ;;  %s1350_s17 = scalar_lea.hbm %s1549_s25, 128 }
  0x2c   : > { %p1351_p10 = scmp.ne.s32.totalorder %s1549_s25, %s1350_s17  ;;  %p1352_p11 = pneg %p1553_p7 }
  0x2d   : > { %s1355_s12 = scalar_lea.hbm %s1787_s0, 512  ;;  %p1356_p0 = scmp.lt.u32.totalorder %s1549_s25, %s1787_s0 }
  0x2e   : > { %p1353_p12 = pnand %p1352_p11, %p1351_p10  ;;  %p1357_p2 = scmp.lt.u32.totalorder %s1355_s12, %s1350_s17 }
  0x2f   : > { %p1359_p6 = scmp.lt.u32.totalorder %s1350_s17, %s1549_s25 }
  0x30   : > { %p1354_p13 = pneg %p1353_p12  ;;  %p1358_p3 = por %p1357_p2, %p1356_p0 }
  0x32   : > { %p1360_p8 = por %p1359_p6, %p1358_p3 }
  0x34   : > { %p1361_p9 = pnand %p1360_p8, %p1354_p13 }
  0x36   : > { %1364 = shalt.err (!%p1361_p9)
}
  0x37   : > { %s1365_s20 = scalar_lea.vmem %s1551_s14, 128  ;;  %s1423_s22 = smov [#allocation2]  }
  0x38   : > { %p1366_p1 = scmp.ne.s32.totalorder %s1551_s14, %s1365_s20  ;;  %s1370_s23 = sshll.u32 %s1423_s22, 4  ;;  %s1371_s23 = int_to_ptr.vmem [resolvable:$false] %s1370_s23 }
  0x39   : > { %s1372_s24 = scalar_lea.vmem %s1371_s23, 256  ;;  %p1373_p10 = scmp.lt.s32.totalorder %s1551_s14, %s1371_s23 }
  0x3a   : > { %p1368_p4 = pnand %p1366_p1, %p1352_p11  ;;  %p1374_p12 = scmp.lt.s32.totalorder %s1372_s24, %s1365_s20 }
  0x3c   : > { %p1369_p5 = pneg %p1368_p4  ;;  %p1375_p0 = por %p1374_p12, %p1373_p10 }
  0x3e   : > { %p1376_p2 = pnand %p1375_p0, %p1369_p5 }
  0x40   : > { %1379 = shalt.err (!%p1376_p2)
}
  0x41   : > { %1274 = dma.hbm_to_vmem [thread:$0]  (!%p1553_p7), %s1549_s25, 128, %s1551_s14, %s273_s30  }
  0x42   : > { %p1803_p13 = scmp.ne.s32.totalorder %s1800_s11, 0 }
  0x43   : > { %s301_s13 = sand.u32 (!%p1803_p13), 1, %s1410_s28   ;;  %p1804_p11 = scmp.ne.s32.totalorder (!%p1803_p13), %s1799_s10, 0 }
  0x44   : > { %299 = sbr.rel (%p1803_p13) target bundleno = 1612 (0x64c), region = 52  ;;  %s1011_s17 = sshll.u32 (!%p1803_p13), %s301_s13, 3 }
  0x45   : > { %s302_s26 = scalar_lea.sflag (!%p1803_p13), [#allocation3], %s301_s13  ;;  %s305_s27 = scalar_lea.vmem (!%p1803_p13), [#allocation2], %s1011_s17 }
  0x4b   : > { %1397 = dma.done.wait (%p1804_p11), %s302_s26, 128  }
  0x4c   : > { %1399 = vsyncadd (%p1804_p11), %s302_s26, 4294967168  ;;  %p1805_p3 = scmp.eq.s32.totalorder %s1491_s9, 0 }
  0x4e   : > { %1401 = dma.done.wait (%p1805_p3), [#allocation5], 256   ;;  %p1806_p6 = pmov %p1805_p3 }
  0x4f   : > { %v1424_v0 = vmov 0.0   ;;  %vm1425_vm0 = vmmov 0   ;;  %v1426_v1 = vmov 0.0|0.0   ;;  %v1316_v2 = vld [vmem:[#allocation4] sm:$0xff]   ;;  %v1317_v3 = vld [vmem:[#allocation4 + $0x8] sm:$0xff]   ;;  %v354_v4 = vld [vmem:[%s305_s27] sm:$0xff] }
  0x50   : > { %1403 = vsyncadd (%p1806_p6), [#allocation5], 4294967040  ;;  %1093 = vmatprep.subr.bf16.mxu0 %v1424_v0  ;;  %1097 = vmatprep.mubr.msk.bf16.mxu0 %vm1425_vm0, %v1424_v0  ;;  %v423_v5 = vld [vmem:[%s1791_s4] sm:$0xff]  ;;  %v424_v6 = vld [vmem:[%s1791_s4 + $0x8] sm:$0xff]  ;;  %v355_v10 = vpack.c.bf16 %v354_v4, %v354_v4  ;;  %vm379_vm1 = vcmask 261120   ;;  %vm431_vm2 = vcmask 523264  }
  0x51   : > { %1201 = vmatprep.subr.bf16.mxu1 %v1426_v1  ;;  %1117 = vmatprep.mubr.msk.f32.mxu1 %vm1425_vm0, %v1424_v0  ;;  %v1202_v7 = vpack.c.bf16 %v424_v6, %v423_v5  ;;  %v425_v8 = vld [vmem:[%s1791_s4 + $0x10] sm:$0xff]  ;;  %v426_v9 = vld [vmem:[%s1791_s4 + $0x18] sm:$0xff]  ;;  %v427_v12 = vld [vmem:[%s1791_s4 + $0x20] sm:$0xff]  ;;  %p345_p7 = scmp.lt.s32.totalorder %s1491_s9, 3  ;;  %vm760_vm3 = vcmask 64512  }
  0x52   : > { %1094 = vmatpush3.bf16.msra.mxu0 %v1316_v2  ;;  %v1205_v11 = vpack.c.bf16 %v426_v9, %v425_v8  ;;  %v428_v13 = vld [vmem:[%s1791_s4 + $0x28] sm:$0xff]  ;;  %v429_v15 = vld [vmem:[%s1791_s4 + $0x30] sm:$0xff]  ;;  %v430_v16 = vld [vmem:[%s1791_s4 + $0x38] sm:$0xff] }
  0x53   : > { %1095 = vmatprep.subr.bf16.mxu0 %v1424_v0  ;;  %1203 = vmatpush3.bf16.msra.mxu1 %v1202_v7  ;;  %v1208_v14 = vpack.c.bf16 %v428_v13, %v427_v12  ;;  %v1211_v17 = vpack.c.bf16 %v430_v16, %v429_v15  ;;  %v1020_v18 = vld [vmem:[%s1791_s4 + $0x40] sm:$0xff]  ;;  %v1021_v19 = vld [vmem:[%s1791_s4 + $0x48] sm:$0xff]  ;;  %v1022_v20 = vld [vmem:[%s1791_s4 + $0x50] sm:$0xff]  ;;  %s1812_s9 = smov (!%p345_p7, %s1491_s9), 3 }
  0x54   : > { %1204 = vmatprep.subr.bf16.mxu1 %v1426_v1  ;;  %v1214_v21 = vpack.c.bf16 %v1021_v19, %v1020_v18  ;;  %v1023_v22 = vld [vmem:[%s1791_s4 + $0x58] sm:$0xff]  ;;  %v1024_v24 = vld [vmem:[%s1791_s4 + $0x60] sm:$0xff]  ;;  %v1025_v25 = vld [vmem:[%s1791_s4 + $0x68] sm:$0xff]  ;;  %s1013_s24 = sshll.u32 %s1812_s9, 3 }
  0x55   : > { %v1217_v23 = vpack.c.bf16 %v1023_v22, %v1022_v20  ;;  %v1220_v26 = vpack.c.bf16 %v1025_v25, %v1024_v24  ;;  %v1015_v27 = vld [vmem:[%s1789_s2] ss:$0 sm:$0xff]  ;;  %v1026_v33 = vld [vmem:[%s1791_s4 + $0x70] sm:$0xff]  ;;  %v1027_v34 = vld [vmem:[%s1791_s4 + $0x78] sm:$0xff]  ;;  %s348_s26 = scalar_lea.vmem %s1790_s3, %s1013_s24  ;;  %s352_s16 = scalar_lea.vmem %s1795_s8, %s1013_s24 }
  0x56   : > { %1096 = vmatpush3.bf16.msra.mxu0 %v1317_v3  ;;  %v1223_v35 = vpack.c.bf16 %v1027_v34, %v1026_v33  ;;  %v1029_v36 = vld [vmem:[%s1791_s4 + $0x80] sm:$0xff]  ;;  %v1030_v37 = vld [vmem:[%s1791_s4 + $0x88] sm:$0xff]  ;;  %v1031_v38 = vld [vmem:[%s1791_s4 + $0x90] sm:$0xff] }
  0x57   : > { %1213 = vmatprep.subr.bf16.mxu0 %v1426_v1  ;;  %1206 = vmatpush3.bf16.msra.mxu1 %v1205_v11  ;;  %v1226_v39 = vpack.c.bf16 %v1030_v37, %v1029_v36  ;;  %v1032_v40 = vld [vmem:[%s1791_s4 + $0x98] sm:$0xff]  ;;  %v1033_v42 = vld [vmem:[%s1791_s4 + $0xa0] sm:$0xff]  ;;  %v1034_v43 = vld [vmem:[%s1791_s4 + $0xa8] sm:$0xff] }
  0x58   : > { %1207 = vmatprep.subr.bf16.mxu1 %v1426_v1  ;;  %v1229_v41 = vpack.c.bf16 %v1032_v40, %v1031_v38  ;;  %v1232_v44 = vpack.c.bf16 %v1034_v43, %v1033_v42  ;;  %v1035_v48 = vld [vmem:[%s1791_s4 + $0xb0] sm:$0xff]  ;;  %v1036_v49 = vld [vmem:[%s1791_s4 + $0xb8] sm:$0xff]  ;;  %v675_v54 = vld [vmem:[%s1792_s5] sm:$0xff] }
  0x59   : > { %1098 = vmatmul.mubr.msk.bf16.vlgmr.msra.gmra.mrb[0].mxu0 %vm379_vm1, %v355_v10  ;;  %v1235_v50 = vpack.c.bf16 %v1036_v49, %v1035_v48  ;;  %v676_v55 = vld [vmem:[%s1792_s5 + $0x8] sm:$0xff]  ;;  %v677_v57 = vld [vmem:[%s1792_s5 + $0x10] sm:$0xff]  ;;  %v678_v58 = vld [vmem:[%s1792_s5 + $0x18] sm:$0xff] }
  0x5a   : > { %1136 = vmatprep.mubr.msk.f32.mxu0 %vm1425_vm0, %v1424_v0  ;;  %1215 = vmatpush3.bf16.msra.mxu0 %v1214_v21  ;;  %v1238_v56 = vpack.c.bf16 %v676_v55, %v675_v54  ;;  %v1241_v59 = vpack.c.bf16 %v678_v58, %v677_v57  ;;  %v679_v60 = vld [vmem:[%s1792_s5 + $0x20] sm:$0xff]  ;;  %v680_v61 = vld [vmem:[%s1792_s5 + $0x28] sm:$0xff]  ;;  %v681_v63 = vld [vmem:[%s1792_s5 + $0x30] sm:$0xff] }
  0x5b   : > { %1209 = vmatpush3.bf16.msra.mxu1 %v1208_v14  ;;  %1216 = vmatprep.subr.bf16.mxu0 %v1426_v1  ;;  %v1244_v62 = vpack.c.bf16 %v680_v61, %v679_v60  ;;  %v682_v2 = vld [vmem:[%s1792_s5 + $0x38] sm:$0xff]  ;;  %v759_v10 = vld [vmem:[%s1793_s6] sm:$0xff]  ;;  %v836_v12 = vld [vmem:[%s1794_s7 + $0x8] sm:$0xff] }
  0x5c   : > { %1210 = vmatprep.subr.bf16.mxu1 %v1426_v1  ;;  %v1247_v3 = vpack.c.bf16 %v682_v2, %v681_v63  ;;  %v835_v11 = vld [vmem:[%s1794_s7] sm:$0xff]  ;;  %v837_v13 = vld [vmem:[%s1794_s7 + $0x10] sm:$0xff]  ;;  %v838_v14 = vld [vmem:[%s1794_s7 + $0x18] sm:$0xff] }
  0x5d   : > { %v1253_v15 = vpack.c.bf16 %v838_v14, %v837_v13  ;;  %v839_v16 = vld [vmem:[%s1794_s7 + $0x20] sm:$0xff]  ;;  %v841_v24 = vld [vmem:[%s1794_s7 + $0x30] sm:$0xff] }
  0x5e   : > { %1218 = vmatpush3.bf16.msra.mxu0 %v1217_v23  ;;  %v756_v21 = vld [vmem:[%s348_s26] sm:$0xff] }
  0x5f   : > { %1212 = vmatpush3.bf16.msra.mxu1 %v1211_v17  ;;  %1219 = vmatprep.subr.bf16.mxu0 %v1426_v1  ;;  %v840_v17 = vld [vmem:[%s1794_s7 + $0x28] sm:$0xff] }
  0x60   : > { %1225 = vmatprep.subr.bf16.mxu1 %v1426_v1  ;;  %v1256_v18 = vpack.c.bf16 %v840_v17, %v839_v16 }
  0x62   : > { %1221 = vmatpush3.bf16.msra.mxu0 %v1220_v26 }
  0x63   : > { %1222 = vmatprep.subr.bf16.mxu0 %v1426_v1 }
  0x66   : > { %1224 = vmatpush3.bf16.msra.mxu0 %v1223_v35 }
  0x67   : > { %1237 = vmatprep.subr.bf16.mxu0 %v1426_v1 }
 0x12c   : > { %v417_v28 = vpop.f32.mrb[0].mxu0 }
 0x12d   : > { %v1655_v29 = vadd.f32 %v1015_v27, %v417_v28  ;;  %v1099_v30 = vpop.f32.mrb[1].mxu0 }
 0x12e   : > { %v420_v31 = vpop.f32.mrb[2].mxu0 }
 0x12f   : > { %v1100_v32 = vpop.f32.mrb[3].mxu0  ;;  %1118 = vmatmul.mubr.msk.f32.vlgmr.msra.gmra.mrb[0].mxu1 %vm431_vm2, %v1655_v29 }
 0x130   : > { %1155 = vmatprep.mubr.msk.f32.mxu1 %vm1425_vm0, %v1424_v0  ;;  %1227 = vmatpush3.bf16.msra.mxu1 %v1226_v39 }
 0x131   : > { %1228 = vmatprep.subr.bf16.mxu1 %v1426_v1 }
 0x134   : > { %1230 = vmatpush3.bf16.msra.mxu1 %v1229_v41 }
 0x135   : > { %1231 = vmatprep.subr.bf16.mxu1 %v1426_v1 }
 0x138   : > { %1233 = vmatpush3.bf16.msra.mxu1 %v1232_v44 }
 0x139   : > { %1234 = vmatprep.subr.bf16.mxu1 %v1426_v1 }
 0x13c   : > { %1236 = vmatpush3.bf16.msra.mxu1 %v1235_v50 }
 0x13d   : > { %1249 = vmatprep.subr.bf16.mxu1 %v1426_v1 }
 0x202   : > { %v501_v45 = vpop.f32.mrb[0].mxu1 }
 0x203   : > { %v505_v46 = vmax.f32 %v1655_v29, %v501_v45  ;;  %v1119_v47 = vpop.f32.mrb[1].mxu1 }
 0x205   : > { %1137 = vmatmul.mubr.msk.f32.vlgmr.msra.gmra.mrb[4].mxu0 %vm431_vm2, %v505_v46 }
 0x206   : > { %1174 = vmatprep.mubr.msk.f32.mxu0 %vm1425_vm0, %v1424_v0  ;;  %1239 = vmatpush3.bf16.msra.mxu0 %v1238_v56 }
 0x207   : > { %1240 = vmatprep.subr.bf16.mxu0 %v1426_v1 }
 0x20a   : > { %1242 = vmatpush3.bf16.msra.mxu0 %v1241_v59 }
 0x20b   : > { %1243 = vmatprep.subr.bf16.mxu0 %v1426_v1 }
 0x20e   : > { %1245 = vmatpush3.bf16.msra.mxu0 %v1244_v62 }
 0x20f   : > { %1246 = vmatprep.subr.bf16.mxu0 %v1426_v1 }
 0x212   : > { %1248 = vmatpush3.bf16.msra.mxu0 %v1247_v3 }
 0x213   : > { %1177 = vmatprep.subr.mxu0 %v1424_v0 }
 0x2d8   : > { %v584_v51 = vpop.f32.mrb[4].mxu0 }
 0x2d9   : > { %v588_v52 = vmax.f32 %v505_v46, %v584_v51  ;;  %v1138_v53 = vpop.f32.mrb[5].mxu0 }
 0x2db   : > { %1156 = vmatmul.mubr.msk.f32.vlgmr.msra.gmra.mrb[2].mxu1 %vm431_vm2, %v588_v52 }
 0x2dc   : > { %1198 = vmatprep.mubr.msk.f32.mxu1 %vm1425_vm0, %v1424_v0 }
 0x3ae   : > { %v667_v4 = vpop.f32.mrb[2].mxu1 }
 0x3af   : > { %v671_v5 = vmax.f32 %v588_v52, %v667_v4  ;;  %v1157_v6 = vpop.f32.mrb[3].mxu1 }
 0x3b1   : > { %v672_v7 = vsub.f32 %v1655_v29, %v671_v5 }
 0x3b3   : > { %v673_v8 = vmul.f32 1.442695, %v672_v7 }
 0x3b5   : > { %1318 = vpow2.f32 %v673_v8 }
 0x3bf   : > { %v1319_v9 = vpop.eup %1318 }
 0x3c0   : > { %1175 = vmatmul.mubr.msk.f32.vlgmr.msra.gmra.mrb[6].mxu0 %vm431_vm2, %v1319_v9 }
 0x3c1   : > { %1179 = vmatprep.mubr.msk.f32.mxu0 %vm1425_vm0, %v1424_v0  ;;  %1178 = vmatpush3.msra.mxu0 %v759_v10  ;;  %v1250_v0 = vpack.c.bf16 %v836_v12, %v835_v11 }
 0x3c3   : > { %1251 = vmatpush3.bf16.msra.mxu1 %v1250_v0 }
 0x3c4   : > { %1252 = vmatprep.subr.bf16.mxu1 %v1426_v1 }
 0x3c7   : > { %1254 = vmatpush3.bf16.msra.mxu1 %v1253_v15 }
 0x3c8   : > { %1255 = vmatprep.subr.bf16.mxu1 %v1426_v1 }
 0x3cb   : > { %1257 = vmatpush3.bf16.msra.mxu1 %v1256_v18 }
 0x3cc   : > { %1258 = vmatprep.subr.bf16.mxu1 %v1426_v1  ;;  %v842_v1 = vld [vmem:[%s1794_s7 + $0x38] sm:$0xff] }
 0x3cd   : > { %v1259_v25 = vpack.c.bf16 %v842_v1, %v841_v24 }
 0x3cf   : > { %1260 = vmatpush3.bf16.msra.mxu1 %v1259_v25 }
 0x493   : > { %v752_v19 = vpop.f32.mrb[6].mxu0 }
 0x494   : > { %1320 = vrcp.f32 %v752_v19  ;;  %v1176_v20 = vpop.f32.mrb[7].mxu0 }
 0x49e   : > { %v1321_v22 = vpop.eup %1320 }
 0x49f   : > { %v758_v23 = vmul.f32 %v1321_v22, %v756_v21 }
 0x4a1   : > { %1180 = vmatmul.mubr.msk.f32.vlgmr.msra.gmra.mrb[8].mxu0 %vm760_vm3, %v758_v23 }
 0x574   : > { %v830_v26 = vpop.f32.mrb[8].mxu0 }
 0x575   : > { %v834_v27 = vmul.f32 %v1319_v9, %v830_v26  ;;  %v1181_v28 = vpop.f32.mrb[9].mxu0 }
 0x577   : > { %1199 = vmatmul.mubr.msk.f32.vlgmr.msra.gmra.mrb[4].mxu1 %vm431_vm2, %v834_v27 }
 0x64a   : > { %v912_v29 = vpop.f32.mrb[4].mxu1 }
 0x64b   : > { %916 = vst.msk [vmem:[%s352_s16] sm:$0xff] %vm760_vm3, %v912_v29  ;;  %v1200_v30 = vpop.f32.mrb[5].mxu1 }
 0x64c PF: > { %p19_p8 = scmp.ge.s32.totalorder %s1516_s15, 6   ;;  %s1807_s27 = smov %s1410_s28 }
 0x64d   : > { %s1808_s28 = smov %s1414_s29  ;;  %s1809_s29 = smov %s1542_s19 }
 0x64e   : > { %s1810_s30 = smov %s1516_s15  ;;  %21 = sbr.rel (!%p19_p8) target bundleno = 4 (0x4), region = 101 }
 0x655   :  { %936 = vsyncpa [#allocation3], 1 }
 0x656   :  { %938 = vsyncpa [#allocation3 + $0x1], 1 }
 0x657   :  { %939 = vsyncpa [#allocation5], 1 }

</bundles_post_ra>
